<compile_context>
chip_gen: v5e
topology: v5e:2x2
jax: 0.10.0
libtpu: 0.0.40
codegen_flags: <defaults>
</compile_context>

<pallas_src>
import jax
import jax.numpy as jnp
from jax.experimental import pallas as pl
from jax.experimental.pallas import tpu as pltpu


def _encoder_kernel(docs_ref, proj_ref, table_ref, out_ref):
    """One grid step: a block of `bblk` batch elements.

    docs_ref : (bblk*D, 1) int32   token ids (pre-flattened in the wrapper)
    proj_ref : (bblk, S, D)        compute_dtype
    table_ref: (V1p, 2H)           compute_dtype, fused [key|value] table,
                                   vocab padded to a multiple of 128
    out_ref  : (bblk, S, 2H)       float32
    """
    bblk, s, d = proj_ref.shape
    v1p, h2 = table_ref.shape

    # --- in-kernel embedding gather via exact one-hot matmul (MXU) ----------
    ids = docs_ref[...]                                              # (bblk*D, 1)
    iota = jax.lax.broadcasted_iota(jnp.int32, (bblk * d, v1p), 1)   # lane iota
    onehot = (iota == ids).astype(table_ref.dtype)                   # (bblk*D, V1p)
    emb = jnp.dot(onehot, table_ref[...],
                  preferred_element_type=jnp.float32)                # (bblk*D, 2H) f32
    emb = emb.reshape(bblk, d, h2).astype(proj_ref.dtype)            # (bblk, D, 2H)

    # --- fused keys|values batched matmul ------------------------------------
    out = jnp.einsum("bsd,bdh->bsh", proj_ref[...], emb,
                     preferred_element_type=jnp.float32)             # (bblk, S, 2H)
    out_ref[...] = out.astype(out_ref.dtype)


def sentence_encoder_forward(docs, proj_mat, key_table, value_table, *,
                             block_b=None, compute_dtype=jnp.float32):
    """
    Args:
        docs:        (B, D) int32 token ids in [0, vocab_size]   (vocab_size == padding_idx)
        proj_mat:    (B, S, D) float32
        key_table:   (vocab_size + 1, H) float32  (row vocab_size is the zero padding row)
        value_table: (vocab_size + 1, H) float32
    Returns:
        keys:   (B, S, H) float32
        values: (B, S, H) float32
    """
    B, D = docs.shape
    S = proj_mat.shape[1]
    V1, H = key_table.shape

    if block_b is None:
        block_b = B                      # toy shapes: whole batch in one grid step
    assert B % block_b == 0, "block_b must divide the batch size"
    grid = (B // block_b,)

    # Fuse the two tables along hidden and pad the vocab axis to a multiple of
    # 128 (padded rows are zero and are never selected since ids < V1).
    v1p = ((V1 + 127) // 128) * 128
    fused_table = jnp.concatenate([key_table, value_table], axis=1)
    fused_table = jnp.pad(fused_table, ((0, v1p - V1), (0, 0)))
    fused_table = fused_table.astype(compute_dtype)

    proj_c = proj_mat.astype(compute_dtype)
    docs_flat = docs.astype(jnp.int32).reshape(B * D, 1)

    out = pl.pallas_call(
        _encoder_kernel,
        out_shape=jax.ShapeDtypeStruct((B, S, 2 * H), jnp.float32),
        grid_spec=pltpu.PrefetchScalarGridSpec(
            num_scalar_prefetch=0,
            grid=grid,
            in_specs=[
                pl.BlockSpec((block_b * D, 1), lambda i: (i, 0)),      # docs (flattened)
                pl.BlockSpec((block_b, S, D), lambda i: (i, 0, 0)),    # proj_mat
                pl.BlockSpec((v1p, 2 * H), lambda i: (0, 0)),          # fused table (resident)
            ],
            out_specs=pl.BlockSpec((block_b, S, 2 * H), lambda i: (i, 0, 0)),
        ),
        compiler_params=pltpu.CompilerParams(
            dimension_semantics=("parallel",),
        ),
    )(docs_flat, proj_c, fused_table)

    keys = out[..., :H]
    values = out[..., H:]
    return keys, values


if __name__ == "__main__":
    # Small shapes consistent with the module's forward.
    B = 2          # batch_size
    D = 16         # max_doc_size
    S = 8          # max_sent
    H = 32         # hidden_size
    VOCAB = 100    # vocab_size (padding_idx == VOCAB)

    key = jax.random.PRNGKey(0)
    k_docs, k_proj, k_ktab, k_vtab = jax.random.split(key, 4)

    # docs include a few padding tokens (id == VOCAB)
    docs = jax.random.randint(k_docs, (B, D), 0, VOCAB + 1, dtype=jnp.int32)
    proj_mat = jax.random.normal(k_proj, (B, S, D), dtype=jnp.float32)

    # Deterministic embedding tables (nn.Embedding(vocab_size+1, hidden_size)),
    # with the padding row (index VOCAB) set to zeros, as padding_idx does.
    key_table = jax.random.normal(k_ktab, (VOCAB + 1, H), dtype=jnp.float32)
    value_table = jax.random.normal(k_vtab, (VOCAB + 1, H), dtype=jnp.float32)
    key_table = key_table.at[VOCAB].set(0.0)
    value_table = value_table.at[VOCAB].set(0.0)

    # Plain-JAX reference (inference-mode dropout = identity).
    ref_keys = jnp.einsum("bsd,bdh->bsh", proj_mat, key_table[docs])
    ref_values = jnp.einsum("bsd,bdh->bsh", proj_mat, value_table[docs])

    # f32 compute path.
    keys32, vals32 = sentence_encoder_forward(
        docs, proj_mat, key_table, value_table, compute_dtype=jnp.float32)
    keys32 = jax.block_until_ready(keys32)
    vals32 = jax.block_until_ready(vals32)
    assert jnp.allclose(keys32, ref_keys, atol=2e-2, rtol=2e-2)
    assert jnp.allclose(vals32, ref_values, atol=2e-2, rtol=2e-2)

    # bf16 compute path (v6e/v7x MXU fast path); looser tolerance for bf16 rounding.
    keys16, vals16 = sentence_encoder_forward(
        docs, proj_mat, key_table, value_table, compute_dtype=jnp.bfloat16)
    keys16 = jax.block_until_ready(keys16)
    vals16 = jax.block_until_ready(vals16)
    assert jnp.allclose(keys16, ref_keys, atol=1e-1, rtol=5e-2)
    assert jnp.allclose(vals16, ref_values, atol=1e-1, rtol=5e-2)

    print("KERNEL_OK")
</pallas_src>

<mosaic_0001>
module attributes {stable_mosaic.version = 11 : i64} {
  func.func @_encoder_kernel(%arg0: i32, %arg1: memref<32x1xi32, #tpu.memory_space<vmem>>, %arg2: memref<2x8x16xf32, #tpu.memory_space<vmem>>, %arg3: memref<128x64xf32, #tpu.memory_space<vmem>>, %arg4: memref<2x8x64xf32, #tpu.memory_space<vmem>>) attributes {dimension_semantics = [#tpu.dimension_semantics<parallel>], iteration_bounds = array<i64: 1>, scalar_prefetch = 0 : i64, scratch_operands = 0 : i64, tpu.core_type = #tpu.core_type<tc>, window_params = [{transform_indices = @transform_0, window_bounds = array<i64: 32, 1>}, {transform_indices = @transform_1, window_bounds = array<i64: 2, 8, 16>}, {pipeline_mode = #tpu.pipeline_mode<synchronous>, transform_indices = @transform_2, window_bounds = array<i64: 128, 64>}, {transform_indices = @transform_3, window_bounds = array<i64: 2, 8, 64>}]} {
    %c0 = arith.constant 0 : index
    %c0_0 = arith.constant 0 : index
    %0 = vector.load %arg1[%c0, %c0_0] : memref<32x1xi32, #tpu.memory_space<vmem>>, vector<32x1xi32>
    %1 = tpu.iota {dimensions = array<i32: 1>} : vector<32x128xi32>
    %2 = vector.broadcast %0 : vector<32x1xi32> to vector<32x128xi32>
    %3 = arith.cmpi eq, %1, %2 : vector<32x128xi32>
    %4 = arith.extui %3 : vector<32x128xi1> to vector<32x128xi32>
    %5 = arith.sitofp %4 : vector<32x128xi32> to vector<32x128xf32>
    %c0_1 = arith.constant 0 : index
    %c0_2 = arith.constant 0 : index
    %6 = vector.load %arg3[%c0_1, %c0_2] : memref<128x64xf32, #tpu.memory_space<vmem>>, vector<128x64xf32>
    %cst = arith.constant dense<0.000000e+00> : vector<32x64xf32>
    %7 = tpu.matmul %5, %6, %cst {dimension_numbers = #tpu.dot_dimension_numbers<[1], [0], [0], [1], [0, 0, 1, 1], [], []>} : vector<32x128xf32>, vector<128x64xf32>, vector<32x64xf32> -> vector<32x64xf32>
    %8 = vector.shape_cast %7 : vector<32x64xf32> to vector<2x16x64xf32>
    %c0_3 = arith.constant 0 : index
    %c0_4 = arith.constant 0 : index
    %c0_5 = arith.constant 0 : index
    %9 = vector.load %arg2[%c0_3, %c0_4, %c0_5] : memref<2x8x16xf32, #tpu.memory_space<vmem>>, vector<2x8x16xf32>
    "tpu.trace_start"() <{level = 10 : i32, message = "bsd,bdh->bsh"}> : () -> ()
    %cst_6 = arith.constant dense<0.000000e+00> : vector<2x8x64xf32>
    %10 = tpu.matmul %9, %8, %cst_6 {dimension_numbers = #tpu.dot_dimension_numbers<[2], [1], [1], [2], [0, 0, 0, 1, 1, 2], [0], [0]>} : vector<2x8x16xf32>, vector<2x16x64xf32>, vector<2x8x64xf32> -> vector<2x8x64xf32>
    "tpu.trace_stop"() : () -> ()
    %c0_7 = arith.constant 0 : index
    %c0_8 = arith.constant 0 : index
    %c0_9 = arith.constant 0 : index
    %11 = vector.load %arg4[%c0_7, %c0_8, %c0_9] : memref<2x8x64xf32, #tpu.memory_space<vmem>>, vector<2x8x64xf32>
    tpu.vector_store %arg4[%c0_7, %c0_8, %c0_9], %10 {strides = array<i32>} : memref<2x8x64xf32, #tpu.memory_space<vmem>>, vector<2x8x64xf32>,
    return
  }
  func.func @transform_0(%arg0: i32) -> (i32, i32) {
    %c0_i32 = arith.constant 0 : i32
    %c0_i32_0 = arith.constant 0 : i32
    return %arg0, %c0_i32 : i32, i32
  }
  func.func @transform_1(%arg0: i32) -> (i32, i32, i32) {
    %c0_i32 = arith.constant 0 : i32
    %c0_i32_0 = arith.constant 0 : i32
    %c0_i32_1 = arith.constant 0 : i32
    return %arg0, %c0_i32, %c0_i32_0 : i32, i32, i32
  }
  func.func @transform_2(%arg0: i32) -> (i32, i32) {
    %c0_i32 = arith.constant 0 : i32
    %c0_i32_0 = arith.constant 0 : i32
    %c0_i32_1 = arith.constant 0 : i32
    return %c0_i32, %c0_i32_0 : i32, i32
  }
  func.func @transform_3(%arg0: i32) -> (i32, i32, i32) {
    %c0_i32 = arith.constant 0 : i32
    %c0_i32_0 = arith.constant 0 : i32
    %c0_i32_1 = arith.constant 0 : i32
    return %arg0, %c0_i32, %c0_i32_0 : i32, i32, i32
  }
}

</mosaic_0001>

<bundles_post_ra>
// kernel: tpu_custom_call.1
= control target key start
LH: loop header
LB: loop body
LE: loop exit
PB: predicated region body
PF: predicated region fallthrough
CT: control target
= control target key end

     0   :  { %v219_v2 = vmov 0   ;;  %s313_s0 = inlined_call_operand.vmem [shape: s32[32,1], index: 0, kind: input, shape index: {}]   ;;  %s314_s1 = inlined_call_operand.vmem [shape: f32[2,8,16], index: 1, kind: input, shape index: {}]   ;;  %s315_s2 = inlined_call_operand.vmem [shape: f32[128,64], index: 2, kind: input, shape index: {}]   ;;  %s316_s3 = inlined_call_operand.hbm [shape: f32[2,8,64], index: 3, kind: output, shape index: {}]  }
   0x1   :  { %v16_v0 = vld [vmem:[%s313_s0 + $0x8] sm:$0xff]  ;;  %v18_v1 = vld [vmem:[%s313_s0 + $0x18] sm:$0xff]  ;;  %191 = vset.pattern.permute.xlu0 %v219_v2  ;;  %192 = vset.pattern.permute.xlu1 %v219_v2  ;;  %v59_v4 = vld [vmem:[%s315_s2 + $0x70] sm:$0xff] }
   0x2   :  { %v60_v3 = vld [vmem:[%s315_s2 + $0x78] sm:$0xff]  ;;  %25 = vperm.xlu0 %191, %v16_v0   ;;  %31 = vperm.xlu1 %192, %v18_v1   ;;  %v58_v5 = vld [vmem:[%s315_s2 + $0x68] sm:$0xff]  ;;  %v57_v6 = vld [vmem:[%s315_s2 + $0x60] sm:$0xff] }
   0x3   :  { %170 = vmatpush.msra.mxu3 %v60_v3  ;;  %61 = vmatpush.msra.mxu0 %v60_v3 }
   0x5   :  { %171 = vmatpush.msra.mxu3 %v59_v4  ;;  %62 = vmatpush.msra.mxu0 %v59_v4 }
   0x6   :  { %8 = vsyncpa [#allocation3], 0  ;;  %v17_v7 = vld [vmem:[%s313_s0 + $0x10] sm:$0xff]  ;;  %v15_v8 = vld [vmem:[%s313_s0] sm:$0xff]  ;;  %v19_v21 = vlaneseq  ;;  %v220_v25 = vmov 1.0   ;;  %vm92_vm4 = vcmask 130048  }
   0x7   :  { %172 = vmatpush.msra.mxu3 %v58_v5  ;;  %63 = vmatpush.msra.mxu0 %v58_v5  ;;  %v56_v9 = vld [vmem:[%s315_s2 + $0x58] sm:$0xff]  ;;  %v55_v10 = vld [vmem:[%s315_s2 + $0x50] sm:$0xff]  ;;  %v54_v11 = vld [vmem:[%s315_s2 + $0x48] sm:$0xff]  ;;  %vm139_vm5 = vcmask 523264   ;;  %s221_s27 = smov [#allocation2]   ;;  %s148_s4 = sshll.u32 %s316_s3, 4  ;;  %s149_s4 = int_to_ptr.hbm [resolvable:$true] %s148_s4 }
   0x8   :  { %v53_v12 = vld [vmem:[%s315_s2 + $0x40] sm:$0xff]  ;;  %v52_v13 = vld [vmem:[%s315_s2 + $0x38] sm:$0xff]  ;;  %v51_v14 = vld [vmem:[%s315_s2 + $0x30] sm:$0xff]  ;;  %v20_v22 = vand.u32 127, %v19_v21  ;;  %s146_s28 = sshll.u32 %s221_s27, 4  ;;  %s222_s5 = smov 128   ;;  %s147_s28 = int_to_ptr.vmem [resolvable:$true] %s146_s28 }
   0x9   :  { %173 = vmatpush.msra.mxu3 %v57_v6  ;;  %64 = vmatpush.msra.mxu0 %v57_v6  ;;  %v50_v15 = vld [vmem:[%s315_s2 + $0x28] sm:$0xff]  ;;  %v49_v16 = vld [vmem:[%s315_s2 + $0x20] sm:$0xff]  ;;  %v48_v17 = vld [vmem:[%s315_s2 + $0x18] sm:$0xff]  ;;  %s223_s6 = smov 8  }
   0xa   :  { %28 = vperm.xlu0 %191, %v17_v7   ;;  %22 = vperm.xlu1 %192, %v15_v8   ;;  %v47_v18 = vld [vmem:[%s315_s2 + $0x10] sm:$0xff]  ;;  %v46_v19 = vld [vmem:[%s315_s2 + $0x8] sm:$0xff]  ;;  %v45_v20 = vld [vmem:[%s315_s2] sm:$0xff] }
   0xb   :  { %174 = vmatpush.msra.mxu3 %v56_v9  ;;  %65 = vmatpush.msra.mxu0 %v56_v9  ;;  %v90_v29 = vld [vmem:[%s314_s1] sm:$0xff]  ;;  %v91_v33 = vld [vmem:[%s314_s1 + $0x8] sm:$0xff] }
   0xd   :  { %175 = vmatpush.msra.mxu3 %v55_v10  ;;  %66 = vmatpush.msra.mxu0 %v55_v10 }
   0xf   :  { %176 = vmatpush.msra.mxu3 %v54_v11  ;;  %67 = vmatpush.msra.mxu0 %v54_v11 }
  0x11   :  { %177 = vmatpush.msra.mxu3 %v53_v12  ;;  %68 = vmatpush.msra.mxu0 %v53_v12 }
  0x13   :  { %178 = vmatpush.msra.mxu3 %v52_v13  ;;  %69 = vmatpush.msra.mxu0 %v52_v13 }
  0x15   :  { %179 = vmatpush.msra.mxu3 %v51_v14  ;;  %70 = vmatpush.msra.mxu0 %v51_v14 }
  0x17   :  { %180 = vmatpush.msra.mxu3 %v50_v15  ;;  %71 = vmatpush.msra.mxu0 %v50_v15 }
  0x19   :  { %181 = vmatpush.msra.mxu3 %v49_v16  ;;  %72 = vmatpush.msra.mxu0 %v49_v16 }
  0x1b   :  { %182 = vmatpush.msra.mxu3 %v48_v17  ;;  %73 = vmatpush.msra.mxu0 %v48_v17 }
  0x1d   :  { %183 = vmatpush.msra.mxu3 %v47_v18  ;;  %74 = vmatpush.msra.mxu0 %v47_v18 }
  0x1f   :  { %184 = vmatpush.msra.mxu3 %v46_v19  ;;  %75 = vmatpush.msra.mxu0 %v46_v19 }
  0x21   :  { %185 = vmatpush.msra.mxu3 %v45_v20  ;;  %76 = vmatpush.msra.mxu0 %v45_v20 }
  0x74   :  { %v26_v23 = vpop.permute.xlu0 %25  ;;  %v32_v24 = vpop.permute.xlu1 %31 }
  0x75   :  { %vm34_vm0 = vcmp.eq.s32.totalorder %v20_v22, %v26_v23  ;;  %vm36_vm3 = vcmp.eq.s32.totalorder %v20_v22, %v32_v24 }
  0x76   :  { %165 = vmatmul.msk.f32.vlgmr.msra.gmra.mxu3 %vm34_vm0, %v220_v25 }
  0x7c   :  { %v29_v26 = vpop.permute.xlu0 %28  ;;  %v23_v27 = vpop.permute.xlu1 %22 }
  0x7d   :  { %vm35_vm1 = vcmp.eq.s32.totalorder %v20_v22, %v29_v26  ;;  %vm33_vm2 = vcmp.eq.s32.totalorder %v20_v22, %v23_v27 }
  0x7e   :  { %166 = vmatmul.msk.f32.gmra.mxu3 %vm35_vm1, %v220_v25  ;;  %164 = vmatmul.msk.f32.vlgmr.msra.gmra.mxu0 %vm33_vm2, %v220_v25 }
  0x86   :  { %167 = vmatmul.msk.f32.gmra.mxu3 %vm36_vm3, %v220_v25 }
  0xf9   :  { %v81_v28 = vpop.f32.mrf.mxu3 }
  0xfa   :  { %110 = vmatpush.msra.mxu1 %v81_v28 }
  0xfb   :  { %v78_v30 = vpop.f32.mrf.mxu0 }
  0xfc   :  { %111 = vmatpush.msra.mxu1 %v78_v30 }
  0xfd   :  { %168 = vmatmul.msk.f32.vlgmr.msra.gmra.mxu1 %vm92_vm4, %v90_v29 }
 0x101   :  { %v84_v31 = vpop.f32.mrf.mxu3 }
 0x109   :  { %v87_v32 = vpop.f32.mrf.mxu3 }
 0x10a   :  { %133 = vmatpush.msra.mxu2 %v87_v32 }
 0x10c   :  { %134 = vmatpush.msra.mxu2 %v84_v31 }
 0x10d   :  { %169 = vmatmul.msk.f32.vlgmr.msra.gmra.mxu2 %vm92_vm4, %v91_v33 }
 0x17a   :  { %v113_v34 = vpop.f32.mrf.mxu1 }
 0x17b   :  { %140 = vst.msk [vmem:[#allocation2] sm:$0xff] %vm139_vm5, %v113_v34 }
 0x190   :  { %v136_v35 = vpop.f32.mrf.mxu2 }
 0x191   :  { %141 = vst.msk [vmem:[#allocation2 + $0x8] sm:$0xff] %vm139_vm5, %v136_v35 }
 0x192   :  { %154 = dma.vmem_to_hbm [thread:$0]  %s147_s28, 256, %s149_s4, [#allocation3], %s222_s5, %s222_s5, %s223_s6  }
 0x193   :  { %217 = dma.done.wait [#allocation3], 256  }
 0x194   :  { %218 = vsyncadd [#allocation3], 4294967040 }
 0x195   :  { %159 = vsyncpa [#allocation3], 1 }

</bundles_post_ra>
